<compile_context>
chip_gen: v6e
topology: v6e:2x2x1
jax: 0.10.0
libtpu: 0.0.40
codegen_flags: <defaults>
</compile_context>

<pallas_src>
import functools

import jax
import jax.numpy as jnp
from jax.experimental import pallas as pl
from jax.experimental.pallas import tpu as pltpu


def _cdiv(a, b):
    return -(-a // b)


# ---------------------------------------------------------------------------
# Kernels: the block is (KN, TH, W). The coarse (TH-granular) reversal of the
# H axis is already done by the input BlockSpec index_map, so the kernel only
# reverses rows *within* the TH-row block.
# ---------------------------------------------------------------------------
def _vflip_block_kernel_flip(x_ref, o_ref):
    # Vectorized sublane reverse: one full-width load, one XLU flip, one store.
    o_ref[...] = jnp.flip(x_ref[...], axis=1)


def _vflip_block_kernel_rows(x_ref, o_ref):
    # Fallback if lax.rev does not lower for this block/dtype: row-at-a-time copy
    # via fori_loop (bounded codegen even for large TH, unrolled when small).
    th = x_ref.shape[1]

    def body(i, c):
        o_ref[:, pl.ds(th - 1 - i, 1), :] = x_ref[:, pl.ds(i, 1), :]
        return c

    jax.lax.fori_loop(0, th, body, 0, unroll=bool(th <= 32))


# ---------------------------------------------------------------------------
# Capability probes (cached; each runs one tiny pallas_call on the TPU).
# ---------------------------------------------------------------------------
@functools.lru_cache(maxsize=None)
def _flip_lowers(th, w, dtype_name) -> bool:
    """True iff jnp.flip lowers & runs correctly for a production-shaped block."""
    try:
        kn = 2
        x = (jnp.arange(kn * th * w, dtype=jnp.float32) % 251.0)
        x = x.astype(dtype_name).reshape(kn, th, w)
        y = pl.pallas_call(
            _vflip_block_kernel_flip,
            out_shape=jax.ShapeDtypeStruct(x.shape, x.dtype),
        )(x)
        return bool(jnp.array_equal(y, jnp.flip(x, axis=1)))
    except Exception:
        return False


@functools.lru_cache(maxsize=1)
def _buffered_ok() -> bool:
    """True iff pipeline_mode=pl.Buffered(3) is accepted and produces correct output."""
    try:
        x = jnp.arange(16 * 16 * 256, dtype=jnp.float32).reshape(16, 16, 256)
        in_spec = pl.BlockSpec((8, 8, 256), lambda n, h: (n, 1 - h, 0),
                               pipeline_mode=pl.Buffered(3))
        out_spec = pl.BlockSpec((8, 8, 256), lambda n, h: (n, h, 0))
        y = pl.pallas_call(
            _vflip_block_kernel_flip,
            out_shape=jax.ShapeDtypeStruct(x.shape, x.dtype),
            grid=(2, 2),
            in_specs=[in_spec],
            out_specs=out_spec,
        )(x)
        return bool(jnp.array_equal(y, jnp.flip(x, axis=1)))
    except Exception:
        return False


@functools.lru_cache(maxsize=1)
def _vmem_cap() -> int:
    try:
        return int(pltpu.get_tpu_info().vmem_capacity_bytes)
    except Exception:
        return 64 << 20  # conservative (v7x physical VMEM)


# ---------------------------------------------------------------------------
# Tiling policy
# ---------------------------------------------------------------------------
def _pick_tiles(n, h, w, itemsize, target_block_bytes):
    """Choose (KN images per block, TH rows per block)."""
    sub = max(8, 32 // itemsize)          # sublane tile: 8 f32, 16 bf16, 32 int8
    row_bytes = w * itemsize
    full_slab = h * row_bytes

    if full_slab <= target_block_bytes:
        th = h                            # whole image per block; batch via KN
    elif h % sub == 0:
        # Largest sublane-multiple tile that divides H and fits the target.
        th = sub
        for cand in range(h, sub - 1, -sub):
            if h % cand == 0 and cand * row_bytes <= target_block_bytes:
                th = cand
                break
    else:
        # Ragged H with a big slab: full-H fallback (KN trimmed by the caller's
        # VMEM sizing).  TODO(synk): split into sub-aligned main + remainder.
        th = h

    slab = max(th * row_bytes, 1)
    kn = max(1, min(n, target_block_bytes // slab))

    n_hblocks = h // th

    def steps(k):
        return _cdiv(n, k) * n_hblocks

    # Megacore balance (v7x): prefer >= 2 grid steps and an even total count.
    if steps(kn) < 2 and n > 1:
        kn = _cdiv(n, 2)
    while kn > 1 and steps(kn) % 2:
        kn -= 1
    return kn, th


# ---------------------------------------------------------------------------
# Main implementation
# ---------------------------------------------------------------------------
@functools.partial(
    jax.jit,
    static_argnames=("use_flip", "use_buffered", "target_block_bytes"))
def _random_vertical_flip_impl(img, key, p, use_flip, use_buffered,
                               target_block_bytes):
    B, C, H, W = img.shape
    N = B * C
    x3 = img.reshape(N, H, W)
    itemsize = jnp.dtype(img.dtype).itemsize

    kn, th = _pick_tiles(N, H, W, itemsize, target_block_bytes)
    n_hblocks = H // th
    n_nblocks = _cdiv(N, kn)

    # Explicit, generation-aware VMEM budget: (#in_bufs + #out_bufs) * block + slack.
    block_bytes = kn * th * W * itemsize
    in_bufs = 3 if use_buffered else 2
    vmem_needed = (in_bufs + 2) * block_bytes
    vmem_upper = max(_vmem_cap() - (8 << 20), 32 << 20)
    vmem_limit = int(min(max(vmem_needed + (4 << 20), 16 << 20), vmem_upper))

    kernel = _vflip_block_kernel_flip if use_flip else _vflip_block_kernel_rows

    in_kwargs = {"pipeline_mode": pl.Buffered(3)} if use_buffered else {}
    # Coarse reversal of the H axis rides the DMA: the input block feeding
    # output block (n, h) is the mirror-image H block (n, nH-1-h).
    in_spec = pl.BlockSpec((kn, th, W),
                           lambda n, h: (n, n_hblocks - 1 - h, 0),
                           **in_kwargs)
    out_spec = pl.BlockSpec((kn, th, W), lambda n, h: (n, h, 0))

    flip_call = pl.pallas_call(
        kernel,
        out_shape=jax.ShapeDtypeStruct((N, H, W), img.dtype),
        grid=(n_nblocks, n_hblocks),
        in_specs=[in_spec],
        out_specs=out_spec,
        compiler_params=pltpu.CompilerParams(
            dimension_semantics=("parallel", "parallel"),
            vmem_limit_bytes=vmem_limit),
        cost_estimate=pl.CostEstimate(
            flops=0, transcendentals=0,
            bytes_accessed=2 * N * H * W * itemsize),
    )

    # torch.rand(1) < self.p
    flip = jax.random.uniform(key, ()) < p
    # Skip the kernel on the no-flip path.  NOTE: XLA's conditional may still
    # materialize a copy for the identity branch; if that matters, the flip flag
    # could instead be scalar-prefetched into the index_map (single always-copy
    # kernel with predictable cost).
    out3 = jax.lax.cond(flip, flip_call, lambda v: v, x3)
    return out3.reshape(B, C, H, W), flip


def random_vertical_flip(img, key, p=0.5, target_block_bytes=4 << 20):
    """JAX/Pallas equivalent of CustomRandomVerticalFlip.forward.

    Returns (output_image, vflip_flag) -- the flag mirrors the module's
    `self.vflip` attribute (True iff the flip was applied).
    """
    B, C, H, W = img.shape
    itemsize = jnp.dtype(img.dtype).itemsize
    kn, th = _pick_tiles(B * C, H, W, itemsize, int(target_block_bytes))
    use_flip = _flip_lowers(th, W, jnp.dtype(img.dtype).name)
    use_buffered = _buffered_ok()
    return _random_vertical_flip_impl(
        img, key, float(p),
        use_flip=use_flip, use_buffered=use_buffered,
        target_block_bytes=int(target_block_bytes))


if __name__ == "__main__":
    key = jax.random.PRNGKey(0)
    k_img, k_flip = jax.random.split(key)

    # 1) Small NCHW test consistent with the module; exercise p=1 / p=0 / p=0.5.
    B, C, H, W = 2, 4, 16, 16
    img = jax.random.normal(k_img, (B, C, H, W), dtype=jnp.float32)
    for p in (1.0, 0.0, 0.5):
        out, vflip = random_vertical_flip(img, k_flip, p=p)
        out = jax.block_until_ready(out)
        flipped = bool(jax.device_get(vflip))
        expected = jnp.flip(img, axis=2) if flipped else img
        assert out.shape == img.shape and out.dtype == img.dtype
        assert jnp.array_equal(out, expected), f"mismatch vs reference (p={p})"

    # 2) Wider image, single full-H block per image.
    img2 = jax.random.normal(k_img, (2, 3, 32, 64), dtype=jnp.float32)
    out2, vflip2 = random_vertical_flip(img2, k_flip, p=1.0)
    jax.block_until_ready(out2)
    assert bool(jax.device_get(vflip2))
    assert jnp.array_equal(out2, jnp.flip(img2, axis=2)), "full-H block mismatch"

    # 3) Multi-H-block path (coarse reversal via index_map), forced with a tiny target.
    img3 = jax.random.normal(k_img, (2, 3, 64, 128), dtype=jnp.float32)
    out3, _ = random_vertical_flip(img3, k_flip, p=1.0, target_block_bytes=16 << 10)
    jax.block_until_ready(out3)
    assert jnp.array_equal(out3, jnp.flip(img3, axis=2)), "multi-block mismatch"

    # 4) Partial last block along N (N=3, kn=2) + even-step megacore heuristic.
    img4 = jax.random.normal(k_img, (1, 3, 16, 128), dtype=jnp.float32)
    out4, _ = random_vertical_flip(img4, k_flip, p=1.0)
    jax.block_until_ready(out4)
    assert jnp.array_equal(out4, jnp.flip(img4, axis=2)), "partial-N mismatch"

    # 5) Ragged H (20 % 8 != 0) -> full-H block path.
    img5 = jax.random.normal(k_img, (2, 2, 20, 128), dtype=jnp.float32)
    out5, _ = random_vertical_flip(img5, k_flip, p=1.0)
    jax.block_until_ready(out5)
    assert jnp.array_equal(out5, jnp.flip(img5, axis=2)), "ragged-H mismatch"

    # 6) Packed-sublane dtype (bf16).
    img6 = jax.random.normal(k_img, (2, 2, 32, 128), dtype=jnp.float32).astype(jnp.bfloat16)
    out6, _ = random_vertical_flip(img6, k_flip, p=1.0)
    jax.block_until_ready(out6)
    assert jnp.array_equal(out6, jnp.flip(img6, axis=2)), "bf16 mismatch"

    print("KERNEL_OK")
</pallas_src>

<mosaic_0001>
module attributes {stable_mosaic.version = 11 : i64} {
  func.func @_vflip_block_kernel_rows(%arg0: i32, %arg1: i32, %arg2: memref<4x16x16xf32, #tpu.memory_space<vmem>>, %arg3: memref<4x16x16xf32, #tpu.memory_space<vmem>>) attributes {dimension_semantics = [#tpu.dimension_semantics<parallel>, #tpu.dimension_semantics<parallel>], iteration_bounds = array<i64: 2, 1>, scalar_prefetch = 0 : i64, scratch_operands = 0 : i64, tpu.core_type = #tpu.core_type<tc>, window_params = [{transform_indices = @transform_0, window_bounds = array<i64: 4, 16, 16>}, {transform_indices = @transform_1, window_bounds = array<i64: 4, 16, 16>}]} {
    %c0_i32 = arith.constant 0 : i32
    %c0 = arith.constant 0 : index
    %0 = arith.index_cast %c0_i32 : i32 to index
    %c0_0 = arith.constant 0 : index
    %1 = vector.load %arg2[%c0, %0, %c0_0] : memref<4x16x16xf32, #tpu.memory_space<vmem>>, vector<4x1x16xf32>
    %c15_i32 = arith.constant 15 : i32
    %2 = arith.subi %c15_i32, %c0_i32 : i32
    %c0_1 = arith.constant 0 : index
    %3 = arith.index_cast %2 : i32 to index
    %c0_2 = arith.constant 0 : index
    %4 = vector.load %arg3[%c0_1, %3, %c0_2] : memref<4x16x16xf32, #tpu.memory_space<vmem>>, vector<4x1x16xf32>
    tpu.vector_store %arg3[%c0_1, %3, %c0_2], %1 {strides = array<i32>} : memref<4x16x16xf32, #tpu.memory_space<vmem>>, vector<4x1x16xf32>,
    %c1_i32 = arith.constant 1 : i32
    %c0_3 = arith.constant 0 : index
    %5 = arith.index_cast %c1_i32 : i32 to index
    %c0_4 = arith.constant 0 : index
    %6 = vector.load %arg2[%c0_3, %5, %c0_4] : memref<4x16x16xf32, #tpu.memory_space<vmem>>, vector<4x1x16xf32>
    %c15_i32_5 = arith.constant 15 : i32
    %7 = arith.subi %c15_i32_5, %c1_i32 : i32
    %c0_6 = arith.constant 0 : index
    %8 = arith.index_cast %7 : i32 to index
    %c0_7 = arith.constant 0 : index
    %9 = vector.load %arg3[%c0_6, %8, %c0_7] : memref<4x16x16xf32, #tpu.memory_space<vmem>>, vector<4x1x16xf32>
    tpu.vector_store %arg3[%c0_6, %8, %c0_7], %6 {strides = array<i32>} : memref<4x16x16xf32, #tpu.memory_space<vmem>>, vector<4x1x16xf32>,
    %c2_i32 = arith.constant 2 : i32
    %c0_8 = arith.constant 0 : index
    %10 = arith.index_cast %c2_i32 : i32 to index
    %c0_9 = arith.constant 0 : index
    %11 = vector.load %arg2[%c0_8, %10, %c0_9] : memref<4x16x16xf32, #tpu.memory_space<vmem>>, vector<4x1x16xf32>
    %c15_i32_10 = arith.constant 15 : i32
    %12 = arith.subi %c15_i32_10, %c2_i32 : i32
    %c0_11 = arith.constant 0 : index
    %13 = arith.index_cast %12 : i32 to index
    %c0_12 = arith.constant 0 : index
    %14 = vector.load %arg3[%c0_11, %13, %c0_12] : memref<4x16x16xf32, #tpu.memory_space<vmem>>, vector<4x1x16xf32>
    tpu.vector_store %arg3[%c0_11, %13, %c0_12], %11 {strides = array<i32>} : memref<4x16x16xf32, #tpu.memory_space<vmem>>, vector<4x1x16xf32>,
    %c3_i32 = arith.constant 3 : i32
    %c0_13 = arith.constant 0 : index
    %15 = arith.index_cast %c3_i32 : i32 to index
    %c0_14 = arith.constant 0 : index
    %16 = vector.load %arg2[%c0_13, %15, %c0_14] : memref<4x16x16xf32, #tpu.memory_space<vmem>>, vector<4x1x16xf32>
    %c15_i32_15 = arith.constant 15 : i32
    %17 = arith.subi %c15_i32_15, %c3_i32 : i32
    %c0_16 = arith.constant 0 : index
    %18 = arith.index_cast %17 : i32 to index
    %c0_17 = arith.constant 0 : index
    %19 = vector.load %arg3[%c0_16, %18, %c0_17] : memref<4x16x16xf32, #tpu.memory_space<vmem>>, vector<4x1x16xf32>
    tpu.vector_store %arg3[%c0_16, %18, %c0_17], %16 {strides = array<i32>} : memref<4x16x16xf32, #tpu.memory_space<vmem>>, vector<4x1x16xf32>,
    %c4_i32 = arith.constant 4 : i32
    %c0_18 = arith.constant 0 : index
    %20 = arith.index_cast %c4_i32 : i32 to index
    %c0_19 = arith.constant 0 : index
    %21 = vector.load %arg2[%c0_18, %20, %c0_19] : memref<4x16x16xf32, #tpu.memory_space<vmem>>, vector<4x1x16xf32>
    %c15_i32_20 = arith.constant 15 : i32
    %22 = arith.subi %c15_i32_20, %c4_i32 : i32
    %c0_21 = arith.constant 0 : index
    %23 = arith.index_cast %22 : i32 to index
    %c0_22 = arith.constant 0 : index
    %24 = vector.load %arg3[%c0_21, %23, %c0_22] : memref<4x16x16xf32, #tpu.memory_space<vmem>>, vector<4x1x16xf32>
    tpu.vector_store %arg3[%c0_21, %23, %c0_22], %21 {strides = array<i32>} : memref<4x16x16xf32, #tpu.memory_space<vmem>>, vector<4x1x16xf32>,
    %c5_i32 = arith.constant 5 : i32
    %c0_23 = arith.constant 0 : index
    %25 = arith.index_cast %c5_i32 : i32 to index
    %c0_24 = arith.constant 0 : index
    %26 = vector.load %arg2[%c0_23, %25, %c0_24] : memref<4x16x16xf32, #tpu.memory_space<vmem>>, vector<4x1x16xf32>
    %c15_i32_25 = arith.constant 15 : i32
    %27 = arith.subi %c15_i32_25, %c5_i32 : i32
    %c0_26 = arith.constant 0 : index
    %28 = arith.index_cast %27 : i32 to index
    %c0_27 = arith.constant 0 : index
    %29 = vector.load %arg3[%c0_26, %28, %c0_27] : memref<4x16x16xf32, #tpu.memory_space<vmem>>, vector<4x1x16xf32>
    tpu.vector_store %arg3[%c0_26, %28, %c0_27], %26 {strides = array<i32>} : memref<4x16x16xf32, #tpu.memory_space<vmem>>, vector<4x1x16xf32>,
    %c6_i32 = arith.constant 6 : i32
    %c0_28 = arith.constant 0 : index
    %30 = arith.index_cast %c6_i32 : i32 to index
    %c0_29 = arith.constant 0 : index
    %31 = vector.load %arg2[%c0_28, %30, %c0_29] : memref<4x16x16xf32, #tpu.memory_space<vmem>>, vector<4x1x16xf32>
    %c15_i32_30 = arith.constant 15 : i32
    %32 = arith.subi %c15_i32_30, %c6_i32 : i32
    %c0_31 = arith.constant 0 : index
    %33 = arith.index_cast %32 : i32 to index
    %c0_32 = arith.constant 0 : index
    %34 = vector.load %arg3[%c0_31, %33, %c0_32] : memref<4x16x16xf32, #tpu.memory_space<vmem>>, vector<4x1x16xf32>
    tpu.vector_store %arg3[%c0_31, %33, %c0_32], %31 {strides = array<i32>} : memref<4x16x16xf32, #tpu.memory_space<vmem>>, vector<4x1x16xf32>,
    %c7_i32 = arith.constant 7 : i32
    %c0_33 = arith.constant 0 : index
    %35 = arith.index_cast %c7_i32 : i32 to index
    %c0_34 = arith.constant 0 : index
    %36 = vector.load %arg2[%c0_33, %35, %c0_34] : memref<4x16x16xf32, #tpu.memory_space<vmem>>, vector<4x1x16xf32>
    %c15_i32_35 = arith.constant 15 : i32
    %37 = arith.subi %c15_i32_35, %c7_i32 : i32
    %c0_36 = arith.constant 0 : index
    %38 = arith.index_cast %37 : i32 to index
    %c0_37 = arith.constant 0 : index
    %39 = vector.load %arg3[%c0_36, %38, %c0_37] : memref<4x16x16xf32, #tpu.memory_space<vmem>>, vector<4x1x16xf32>
    tpu.vector_store %arg3[%c0_36, %38, %c0_37], %36 {strides = array<i32>} : memref<4x16x16xf32, #tpu.memory_space<vmem>>, vector<4x1x16xf32>,
    %c8_i32 = arith.constant 8 : i32
    %c0_38 = arith.constant 0 : index
    %40 = arith.index_cast %c8_i32 : i32 to index
    %c0_39 = arith.constant 0 : index
    %41 = vector.load %arg2[%c0_38, %40, %c0_39] : memref<4x16x16xf32, #tpu.memory_space<vmem>>, vector<4x1x16xf32>
    %c15_i32_40 = arith.constant 15 : i32
    %42 = arith.subi %c15_i32_40, %c8_i32 : i32
    %c0_41 = arith.constant 0 : index
    %43 = arith.index_cast %42 : i32 to index
    %c0_42 = arith.constant 0 : index
    %44 = vector.load %arg3[%c0_41, %43, %c0_42] : memref<4x16x16xf32, #tpu.memory_space<vmem>>, vector<4x1x16xf32>
    tpu.vector_store %arg3[%c0_41, %43, %c0_42], %41 {strides = array<i32>} : memref<4x16x16xf32, #tpu.memory_space<vmem>>, vector<4x1x16xf32>,
    %c9_i32 = arith.constant 9 : i32
    %c0_43 = arith.constant 0 : index
    %45 = arith.index_cast %c9_i32 : i32 to index
    %c0_44 = arith.constant 0 : index
    %46 = vector.load %arg2[%c0_43, %45, %c0_44] : memref<4x16x16xf32, #tpu.memory_space<vmem>>, vector<4x1x16xf32>
    %c15_i32_45 = arith.constant 15 : i32
    %47 = arith.subi %c15_i32_45, %c9_i32 : i32
    %c0_46 = arith.constant 0 : index
    %48 = arith.index_cast %47 : i32 to index
    %c0_47 = arith.constant 0 : index
    %49 = vector.load %arg3[%c0_46, %48, %c0_47] : memref<4x16x16xf32, #tpu.memory_space<vmem>>, vector<4x1x16xf32>
    tpu.vector_store %arg3[%c0_46, %48, %c0_47], %46 {strides = array<i32>} : memref<4x16x16xf32, #tpu.memory_space<vmem>>, vector<4x1x16xf32>,
    %c10_i32 = arith.constant 10 : i32
    %c0_48 = arith.constant 0 : index
    %50 = arith.index_cast %c10_i32 : i32 to index
    %c0_49 = arith.constant 0 : index
    %51 = vector.load %arg2[%c0_48, %50, %c0_49] : memref<4x16x16xf32, #tpu.memory_space<vmem>>, vector<4x1x16xf32>
    %c15_i32_50 = arith.constant 15 : i32
    %52 = arith.subi %c15_i32_50, %c10_i32 : i32
    %c0_51 = arith.constant 0 : index
    %53 = arith.index_cast %52 : i32 to index
    %c0_52 = arith.constant 0 : index
    %54 = vector.load %arg3[%c0_51, %53, %c0_52] : memref<4x16x16xf32, #tpu.memory_space<vmem>>, vector<4x1x16xf32>
    tpu.vector_store %arg3[%c0_51, %53, %c0_52], %51 {strides = array<i32>} : memref<4x16x16xf32, #tpu.memory_space<vmem>>, vector<4x1x16xf32>,
    %c11_i32 = arith.constant 11 : i32
    %c0_53 = arith.constant 0 : index
    %55 = arith.index_cast %c11_i32 : i32 to index
    %c0_54 = arith.constant 0 : index
    %56 = vector.load %arg2[%c0_53, %55, %c0_54] : memref<4x16x16xf32, #tpu.memory_space<vmem>>, vector<4x1x16xf32>
    %c15_i32_55 = arith.constant 15 : i32
    %57 = arith.subi %c15_i32_55, %c11_i32 : i32
    %c0_56 = arith.constant 0 : index
    %58 = arith.index_cast %57 : i32 to index
    %c0_57 = arith.constant 0 : index
    %59 = vector.load %arg3[%c0_56, %58, %c0_57] : memref<4x16x16xf32, #tpu.memory_space<vmem>>, vector<4x1x16xf32>
    tpu.vector_store %arg3[%c0_56, %58, %c0_57], %56 {strides = array<i32>} : memref<4x16x16xf32, #tpu.memory_space<vmem>>, vector<4x1x16xf32>,
    %c12_i32 = arith.constant 12 : i32
    %c0_58 = arith.constant 0 : index
    %60 = arith.index_cast %c12_i32 : i32 to index
    %c0_59 = arith.constant 0 : index
    %61 = vector.load %arg2[%c0_58, %60, %c0_59] : memref<4x16x16xf32, #tpu.memory_space<vmem>>, vector<4x1x16xf32>
    %c15_i32_60 = arith.constant 15 : i32
    %62 = arith.subi %c15_i32_60, %c12_i32 : i32
    %c0_61 = arith.constant 0 : index
    %63 = arith.index_cast %62 : i32 to index
    %c0_62 = arith.constant 0 : index
    %64 = vector.load %arg3[%c0_61, %63, %c0_62] : memref<4x16x16xf32, #tpu.memory_space<vmem>>, vector<4x1x16xf32>
    tpu.vector_store %arg3[%c0_61, %63, %c0_62], %61 {strides = array<i32>} : memref<4x16x16xf32, #tpu.memory_space<vmem>>, vector<4x1x16xf32>,
    %c13_i32 = arith.constant 13 : i32
    %c0_63 = arith.constant 0 : index
    %65 = arith.index_cast %c13_i32 : i32 to index
    %c0_64 = arith.constant 0 : index
    %66 = vector.load %arg2[%c0_63, %65, %c0_64] : memref<4x16x16xf32, #tpu.memory_space<vmem>>, vector<4x1x16xf32>
    %c15_i32_65 = arith.constant 15 : i32
    %67 = arith.subi %c15_i32_65, %c13_i32 : i32
    %c0_66 = arith.constant 0 : index
    %68 = arith.index_cast %67 : i32 to index
    %c0_67 = arith.constant 0 : index
    %69 = vector.load %arg3[%c0_66, %68, %c0_67] : memref<4x16x16xf32, #tpu.memory_space<vmem>>, vector<4x1x16xf32>
    tpu.vector_store %arg3[%c0_66, %68, %c0_67], %66 {strides = array<i32>} : memref<4x16x16xf32, #tpu.memory_space<vmem>>, vector<4x1x16xf32>,
    %c14_i32 = arith.constant 14 : i32
    %c0_68 = arith.constant 0 : index
    %70 = arith.index_cast %c14_i32 : i32 to index
    %c0_69 = arith.constant 0 : index
    %71 = vector.load %arg2[%c0_68, %70, %c0_69] : memref<4x16x16xf32, #tpu.memory_space<vmem>>, vector<4x1x16xf32>
    %c15_i32_70 = arith.constant 15 : i32
    %72 = arith.subi %c15_i32_70, %c14_i32 : i32
    %c0_71 = arith.constant 0 : index
    %73 = arith.index_cast %72 : i32 to index
    %c0_72 = arith.constant 0 : index
    %74 = vector.load %arg3[%c0_71, %73, %c0_72] : memref<4x16x16xf32, #tpu.memory_space<vmem>>, vector<4x1x16xf32>
    tpu.vector_store %arg3[%c0_71, %73, %c0_72], %71 {strides = array<i32>} : memref<4x16x16xf32, #tpu.memory_space<vmem>>, vector<4x1x16xf32>,
    %c15_i32_73 = arith.constant 15 : i32
    %c0_74 = arith.constant 0 : index
    %75 = arith.index_cast %c15_i32_73 : i32 to index
    %c0_75 = arith.constant 0 : index
    %76 = vector.load %arg2[%c0_74, %75, %c0_75] : memref<4x16x16xf32, #tpu.memory_space<vmem>>, vector<4x1x16xf32>
    %c15_i32_76 = arith.constant 15 : i32
    %77 = arith.subi %c15_i32_76, %c15_i32_73 : i32
    %c0_77 = arith.constant 0 : index
    %78 = arith.index_cast %77 : i32 to index
    %c0_78 = arith.constant 0 : index
    %79 = vector.load %arg3[%c0_77, %78, %c0_78] : memref<4x16x16xf32, #tpu.memory_space<vmem>>, vector<4x1x16xf32>
    tpu.vector_store %arg3[%c0_77, %78, %c0_78], %76 {strides = array<i32>} : memref<4x16x16xf32, #tpu.memory_space<vmem>>, vector<4x1x16xf32>,
    %c16_i32 = arith.constant 16 : i32
    return
  }
  func.func @transform_0(%arg0: i32, %arg1: i32) -> (i32, i32, i32) {
    %c0_i32 = arith.constant 0 : i32
    %0 = arith.subi %c0_i32, %arg1 : i32
    %c0_i32_0 = arith.constant 0 : i32
    %c0_i32_1 = arith.constant 0 : i32
    return %arg0, %0, %c0_i32_0 : i32, i32, i32
  }
  func.func @transform_1(%arg0: i32, %arg1: i32) -> (i32, i32, i32) {
    %c0_i32 = arith.constant 0 : i32
    %c0_i32_0 = arith.constant 0 : i32
    return %arg0, %arg1, %c0_i32 : i32, i32, i32
  }
}

</mosaic_0001>

<bundles_post_ra>
// kernel: branch_1_fun.1
= control target key start
LH: loop header
LB: loop body
LE: loop exit
PB: predicated region body
PF: predicated region fallthrough
CT: control target
= control target key end

     0   :  { %6 = vsyncpa [#allocation3], 0  ;;  %s860_s0 = inlined_call_operand.hbm [shape: f32[8,16,16], index: 0, kind: input, shape index: {}]   ;;  %s861_s1 = inlined_call_operand.vmem [shape: f32[8,16,16], index: 1, kind: output, shape index: {}]  }
   0x1   :  { %8 = vsyncpa [#allocation3 + $0x1], 0  ;;  %s569_s6 = smov 0   ;;  %s571_s7 = smov 0  }
   0x2   :  { %s573_s8 = smov 0   ;;  %s575_s9 = smov 0  }
   0x3   :  { %s577_s10 = smov 0   ;;  %s579_s11 = smov 0  }
   0x4 LB: > { %s401_s12 = sadd.s32 4294967295, %s554_s11   ;;  %s26_s13 = sadd.s32 1, %s550_s10  ;;  %s554_s11 = sphi %s579_s11, %s14_s11   ;;  %s550_s10 = sphi %s577_s10, %s869_s10   ;;  %s546_s9 = sphi %s575_s9, %s868_s9   ;;  %s542_s8 = sphi %s573_s8, %s867_s8   ;;  %s538_s7 = sphi %s571_s7, %s866_s7   ;;  %s534_s6 = sphi %s569_s6, %s865_s6  }
   0x5   : > { %p28_p0 = scmp.ge.s32.totalorder %s26_s13, 2  ;;  %s37_s14 = sadd.s32 1, %s542_s8 }
   0x6   : > { %p44_p1 = scmp.ne.s32.totalorder %s542_s8, %s538_s7  ;;  %p45_p2 = scmp.eq.s32.totalorder %s554_s11, 0 }
   0x7   : > { %s871_s13 = smov (%p28_p0, %s26_s13), 0  ;;  %p50_p4 = scmp.ne.s32.totalorder %s538_s7, %s534_s6 }
   0x8   : > { %p605_p3 = por %p45_p2, %p44_p1  ;;  %s32_s16 = ssub.s32 %s550_s10, %s871_s13 }
   0x9   : > { %p51_p5 = scmp.eq.s32.totalorder %s401_s12, 0  ;;  %p35_p6 = scmp.eq.s32.totalorder %s32_s16, 0 }
   0xa   : > { %p425_p8 = scmp.lt.s32.totalorder %s554_s11, 2  ;;  %s102_s19 = sand.u32 1, %s542_s8  }
   0xb   : > { %p612_p7 = por %p51_p5, %p50_p4  ;;  %s417_s20 = sshll.u32 %s550_s10, 10 }
   0xc   : > { %s618_s18 = scalar_select %p35_p6, %s542_s8, %s37_s14  }
   0xd   : > { %s405_s21 = sshll.u32 %s102_s19, 6  ;;  %s116_s24 = scalar_lea.hbm %s860_s0, %s417_s20 }
   0xe   : > { %s106_s25 = scalar_lea.vmem [#allocation2], %s405_s21  ;;  %p627_p9 = pnand %p425_p8, %p605_p3 }
   0xf   : > { %s117_s26 = sshll.u32 %s106_s25, 4  ;;  %s103_s28 = scalar_lea.sflag [#allocation3], %s102_s19  ;;  %s118_s26 = int_to_ptr.vmem [resolvable:$true] %s117_s26 }
  0x10   : > { %p478_p10 = pneg %p627_p9  ;;  %s489_s29 = scalar_lea.vmem %s118_s26, 1024 }
  0x11   : > { %p490_p11 = scmp.ne.s32.totalorder %s118_s26, %s489_s29  ;;  %s556_s30 = smov [#allocation2]  }
  0x12   : > { %s494_s2 = sshll.u32 %s556_s30, 4  ;;  %s495_s2 = int_to_ptr.vmem [resolvable:$false] %s494_s2 }
  0x13   : > { %p492_p12 = pnand %p490_p11, %p478_p10  ;;  %s496_s3 = scalar_lea.vmem %s495_s2, 2048 }
  0x14   : > { %p497_p0 = scmp.lt.s32.totalorder %s118_s26, %s495_s2  ;;  %p498_p1 = scmp.lt.s32.totalorder %s496_s3, %s489_s29 }
  0x15   : > { %p493_p13 = pneg %p492_p12 }
  0x16   : > { %p499_p2 = por %p498_p1, %p497_p0 }
  0x18   : > { %p500_p3 = pnand %p499_p2, %p493_p13 }
  0x1a   : > { %503 = shalt.err (!%p500_p3)
}
  0x1b   : > { %s557_s4 = smov 128   ;;  %s558_s5 = smov 8  }
  0x1c   : > { %424 = dma.hbm_to_vmem [thread:$0]  (!%p627_p9), %s116_s24, 1024, %s118_s26, %s103_s28, %s557_s4, %s557_s4, %s558_s5  }
  0x1d   : > { %p409_p4 = scmp.ge.s32.totalorder %s554_s11, 1  ;;  %p125_p5 = scmp.lt.s32.totalorder %s554_s11, 3 }
  0x1f   : > { %p126_p6 = pnand %p409_p4, %p125_p5 }
  0x20   : > { %s131_s6 = sand.u32 (!%p126_p6), 1, %s538_s7  }
  0x21   : > { %129 = sbr.rel (%p126_p6) target bundleno = 84 (0x54), region = 24  ;;  %s410_s12 = sshll.u32 (!%p126_p6), %s131_s6, 6 }
  0x22   : > { %s132_s14 = scalar_lea.sflag (!%p126_p6), [#allocation3], %s131_s6  ;;  %s638_s15 = scalar_lea.vmem (!%p126_p6), [#allocation2], %s410_s12 }
  0x26   : > { %529 = dma.done.wait (%p612_p7), %s132_s14, 1024  }
  0x27   : > { %531 = vsyncadd (%p612_p7), %s132_s14, 4294966272  ;;  %s411_s16 = sshll.u32 %s546_s9, 2  ;;  %vm178_vm0 = vcmask 122880   ;;  %v174_v0 = vld [vmem:[%s638_s15] sm:$0x1] }
  0x28   : > { %p164_p8 = scmp.lt.s32.totalorder %s411_s16, 7  ;;  %v183_v1 = vld [vmem:[%s638_s15 + $0x1] sm:$0x1]  ;;  %v191_v2 = vld [vmem:[%s638_s15 + $0x2] sm:$0x1] }
  0x29   : > { %v199_v3 = vld [vmem:[%s638_s15 + $0x3] sm:$0x1]  ;;  %v207_v4 = vld [vmem:[%s638_s15 + $0x4] sm:$0x1]  ;;  %v215_v5 = vld [vmem:[%s638_s15 + $0x5] sm:$0x1] }
  0x2a   : > { %s873_s16 = smov (!%p164_p8, %s411_s16), 7  ;;  %v223_v6 = vld [vmem:[%s638_s15 + $0x6] sm:$0x1]  ;;  %v231_v7 = vld [vmem:[%s638_s15 + $0x7] sm:$0x1] }
  0x2b   : > { %s418_s19 = sshll.u32 %s873_s16, 4  ;;  %v239_v8 = vld [vmem:[%s638_s15 + $0x8] sm:$0x1]  ;;  %v247_v9 = vld [vmem:[%s638_s15 + $0x9] sm:$0x1] }
  0x2c   : > { %s648_s17 = scalar_lea.vmem %s861_s1, %s418_s19  ;;  %v255_v10 = vld [vmem:[%s638_s15 + $0xa] sm:$0x1]  ;;  %v263_v11 = vld [vmem:[%s638_s15 + $0xb] sm:$0x1]  ;;  %v271_v12 = vld [vmem:[%s638_s15 + $0xc] sm:$0x1] }
  0x2d   : > { %179 = vst.msk [vmem:[%s648_s17 + $0xf] sm:$0x1] %vm178_vm0, %v174_v0  ;;  %187 = vst.msk [vmem:[%s648_s17 + $0xe] sm:$0x1] %vm178_vm0, %v183_v1  ;;  %v279_v13 = vld [vmem:[%s638_s15 + $0xd] sm:$0x1] }
  0x2e   : > { %195 = vst.msk [vmem:[%s648_s17 + $0xd] sm:$0x1] %vm178_vm0, %v191_v2  ;;  %203 = vst.msk [vmem:[%s648_s17 + $0xc] sm:$0x1] %vm178_vm0, %v199_v3  ;;  %v287_v14 = vld [vmem:[%s638_s15 + $0xe] sm:$0x1] }
  0x2f   : > { %211 = vst.msk [vmem:[%s648_s17 + $0xb] sm:$0x1] %vm178_vm0, %v207_v4  ;;  %219 = vst.msk [vmem:[%s648_s17 + $0xa] sm:$0x1] %vm178_vm0, %v215_v5  ;;  %v295_v15 = vld [vmem:[%s638_s15 + $0xf] sm:$0x1] }
  0x30   : > { %227 = vst.msk [vmem:[%s648_s17 + $0x9] sm:$0x1] %vm178_vm0, %v223_v6  ;;  %235 = vst.msk [vmem:[%s648_s17 + $0x8] sm:$0x1] %vm178_vm0, %v231_v7  ;;  %v175_v16 = vld [vmem:[%s638_s15 + $0x10] sm:$0x1] }
  0x31   : > { %243 = vst.msk [vmem:[%s648_s17 + $0x7] sm:$0x1] %vm178_vm0, %v239_v8  ;;  %251 = vst.msk [vmem:[%s648_s17 + $0x6] sm:$0x1] %vm178_vm0, %v247_v9  ;;  %v184_v17 = vld [vmem:[%s638_s15 + $0x11] sm:$0x1] }
  0x32   : > { %259 = vst.msk [vmem:[%s648_s17 + $0x5] sm:$0x1] %vm178_vm0, %v255_v10  ;;  %267 = vst.msk [vmem:[%s648_s17 + $0x4] sm:$0x1] %vm178_vm0, %v263_v11  ;;  %v192_v18 = vld [vmem:[%s638_s15 + $0x12] sm:$0x1] }
  0x33   : > { %275 = vst.msk [vmem:[%s648_s17 + $0x3] sm:$0x1] %vm178_vm0, %v271_v12  ;;  %283 = vst.msk [vmem:[%s648_s17 + $0x2] sm:$0x1] %vm178_vm0, %v279_v13  ;;  %v200_v19 = vld [vmem:[%s638_s15 + $0x13] sm:$0x1] }
  0x34   : > { %291 = vst.msk [vmem:[%s648_s17 + $0x1] sm:$0x1] %vm178_vm0, %v287_v14  ;;  %299 = vst.msk [vmem:[%s648_s17] sm:$0x1] %vm178_vm0, %v295_v15  ;;  %v208_v20 = vld [vmem:[%s638_s15 + $0x14] sm:$0x1] }
  0x35   : > { %180 = vst.msk [vmem:[%s648_s17 + $0x1f] sm:$0x1] %vm178_vm0, %v175_v16  ;;  %188 = vst.msk [vmem:[%s648_s17 + $0x1e] sm:$0x1] %vm178_vm0, %v184_v17  ;;  %v216_v21 = vld [vmem:[%s638_s15 + $0x15] sm:$0x1] }
  0x36   : > { %196 = vst.msk [vmem:[%s648_s17 + $0x1d] sm:$0x1] %vm178_vm0, %v192_v18  ;;  %204 = vst.msk [vmem:[%s648_s17 + $0x1c] sm:$0x1] %vm178_vm0, %v200_v19  ;;  %v224_v22 = vld [vmem:[%s638_s15 + $0x16] sm:$0x1] }
  0x37   : > { %212 = vst.msk [vmem:[%s648_s17 + $0x1b] sm:$0x1] %vm178_vm0, %v208_v20  ;;  %v232_v23 = vld [vmem:[%s638_s15 + $0x17] sm:$0x1]  ;;  %220 = vst.msk [vmem:[%s648_s17 + $0x1a] sm:$0x1] %vm178_vm0, %v216_v21 }
  0x38   : > { %228 = vst.msk [vmem:[%s648_s17 + $0x19] sm:$0x1] %vm178_vm0, %v224_v22  ;;  %236 = vst.msk [vmem:[%s648_s17 + $0x18] sm:$0x1] %vm178_vm0, %v232_v23  ;;  %v240_v24 = vld [vmem:[%s638_s15 + $0x18] sm:$0x1] }
  0x39   : > { %v248_v25 = vld [vmem:[%s638_s15 + $0x19] sm:$0x1]  ;;  %v256_v26 = vld [vmem:[%s638_s15 + $0x1a] sm:$0x1]  ;;  %244 = vst.msk [vmem:[%s648_s17 + $0x17] sm:$0x1] %vm178_vm0, %v240_v24 }
  0x3a   : > { %252 = vst.msk [vmem:[%s648_s17 + $0x16] sm:$0x1] %vm178_vm0, %v248_v25  ;;  %260 = vst.msk [vmem:[%s648_s17 + $0x15] sm:$0x1] %vm178_vm0, %v256_v26  ;;  %v264_v27 = vld [vmem:[%s638_s15 + $0x1b] sm:$0x1] }
  0x3b   : > { %v272_v28 = vld [vmem:[%s638_s15 + $0x1c] sm:$0x1]  ;;  %v280_v29 = vld [vmem:[%s638_s15 + $0x1d] sm:$0x1]  ;;  %268 = vst.msk [vmem:[%s648_s17 + $0x14] sm:$0x1] %vm178_vm0, %v264_v27 }
  0x3c   : > { %276 = vst.msk [vmem:[%s648_s17 + $0x13] sm:$0x1] %vm178_vm0, %v272_v28  ;;  %284 = vst.msk [vmem:[%s648_s17 + $0x12] sm:$0x1] %vm178_vm0, %v280_v29  ;;  %v288_v30 = vld [vmem:[%s638_s15 + $0x1e] sm:$0x1] }
  0x3d   : > { %v296_v31 = vld [vmem:[%s638_s15 + $0x1f] sm:$0x1]  ;;  %v176_v32 = vld [vmem:[%s638_s15 + $0x20] sm:$0x1]  ;;  %292 = vst.msk [vmem:[%s648_s17 + $0x11] sm:$0x1] %vm178_vm0, %v288_v30 }
  0x3e   : > { %300 = vst.msk [vmem:[%s648_s17 + $0x10] sm:$0x1] %vm178_vm0, %v296_v31  ;;  %181 = vst.msk [vmem:[%s648_s17 + $0x2f] sm:$0x1] %vm178_vm0, %v176_v32  ;;  %v185_v33 = vld [vmem:[%s638_s15 + $0x21] sm:$0x1] }
  0x3f   : > { %v193_v34 = vld [vmem:[%s638_s15 + $0x22] sm:$0x1]  ;;  %v201_v35 = vld [vmem:[%s638_s15 + $0x23] sm:$0x1]  ;;  %189 = vst.msk [vmem:[%s648_s17 + $0x2e] sm:$0x1] %vm178_vm0, %v185_v33 }
  0x40   : > { %197 = vst.msk [vmem:[%s648_s17 + $0x2d] sm:$0x1] %vm178_vm0, %v193_v34  ;;  %205 = vst.msk [vmem:[%s648_s17 + $0x2c] sm:$0x1] %vm178_vm0, %v201_v35  ;;  %v209_v36 = vld [vmem:[%s638_s15 + $0x24] sm:$0x1] }
  0x41   : > { %v217_v37 = vld [vmem:[%s638_s15 + $0x25] sm:$0x1]  ;;  %v225_v38 = vld [vmem:[%s638_s15 + $0x26] sm:$0x1]  ;;  %213 = vst.msk [vmem:[%s648_s17 + $0x2b] sm:$0x1] %vm178_vm0, %v209_v36 }
  0x42   : > { %221 = vst.msk [vmem:[%s648_s17 + $0x2a] sm:$0x1] %vm178_vm0, %v217_v37  ;;  %229 = vst.msk [vmem:[%s648_s17 + $0x29] sm:$0x1] %vm178_vm0, %v225_v38  ;;  %v233_v39 = vld [vmem:[%s638_s15 + $0x27] sm:$0x1] }
  0x43   : > { %v241_v40 = vld [vmem:[%s638_s15 + $0x28] sm:$0x1]  ;;  %v249_v41 = vld [vmem:[%s638_s15 + $0x29] sm:$0x1]  ;;  %237 = vst.msk [vmem:[%s648_s17 + $0x28] sm:$0x1] %vm178_vm0, %v233_v39 }
  0x44   : > { %245 = vst.msk [vmem:[%s648_s17 + $0x27] sm:$0x1] %vm178_vm0, %v241_v40  ;;  %253 = vst.msk [vmem:[%s648_s17 + $0x26] sm:$0x1] %vm178_vm0, %v249_v41  ;;  %v257_v42 = vld [vmem:[%s638_s15 + $0x2a] sm:$0x1] }
  0x45   : > { %v265_v43 = vld [vmem:[%s638_s15 + $0x2b] sm:$0x1]  ;;  %v273_v44 = vld [vmem:[%s638_s15 + $0x2c] sm:$0x1]  ;;  %261 = vst.msk [vmem:[%s648_s17 + $0x25] sm:$0x1] %vm178_vm0, %v257_v42 }
  0x46   : > { %269 = vst.msk [vmem:[%s648_s17 + $0x24] sm:$0x1] %vm178_vm0, %v265_v43  ;;  %277 = vst.msk [vmem:[%s648_s17 + $0x23] sm:$0x1] %vm178_vm0, %v273_v44  ;;  %v281_v45 = vld [vmem:[%s638_s15 + $0x2d] sm:$0x1] }
  0x47   : > { %v289_v46 = vld [vmem:[%s638_s15 + $0x2e] sm:$0x1]  ;;  %v297_v47 = vld [vmem:[%s638_s15 + $0x2f] sm:$0x1]  ;;  %285 = vst.msk [vmem:[%s648_s17 + $0x22] sm:$0x1] %vm178_vm0, %v281_v45 }
  0x48   : > { %293 = vst.msk [vmem:[%s648_s17 + $0x21] sm:$0x1] %vm178_vm0, %v289_v46  ;;  %301 = vst.msk [vmem:[%s648_s17 + $0x20] sm:$0x1] %vm178_vm0, %v297_v47  ;;  %v177_v48 = vld [vmem:[%s638_s15 + $0x30] sm:$0x1] }
  0x49   : > { %v186_v49 = vld [vmem:[%s638_s15 + $0x31] sm:$0x1]  ;;  %v194_v50 = vld [vmem:[%s638_s15 + $0x32] sm:$0x1]  ;;  %182 = vst.msk [vmem:[%s648_s17 + $0x3f] sm:$0x1] %vm178_vm0, %v177_v48 }
  0x4a   : > { %190 = vst.msk [vmem:[%s648_s17 + $0x3e] sm:$0x1] %vm178_vm0, %v186_v49  ;;  %198 = vst.msk [vmem:[%s648_s17 + $0x3d] sm:$0x1] %vm178_vm0, %v194_v50  ;;  %v202_v51 = vld [vmem:[%s638_s15 + $0x33] sm:$0x1] }
  0x4b   : > { %v210_v52 = vld [vmem:[%s638_s15 + $0x34] sm:$0x1]  ;;  %v218_v53 = vld [vmem:[%s638_s15 + $0x35] sm:$0x1]  ;;  %206 = vst.msk [vmem:[%s648_s17 + $0x3c] sm:$0x1] %vm178_vm0, %v202_v51 }
  0x4c   : > { %214 = vst.msk [vmem:[%s648_s17 + $0x3b] sm:$0x1] %vm178_vm0, %v210_v52  ;;  %222 = vst.msk [vmem:[%s648_s17 + $0x3a] sm:$0x1] %vm178_vm0, %v218_v53  ;;  %v226_v54 = vld [vmem:[%s638_s15 + $0x36] sm:$0x1] }
  0x4d   : > { %v234_v55 = vld [vmem:[%s638_s15 + $0x37] sm:$0x1]  ;;  %v242_v56 = vld [vmem:[%s638_s15 + $0x38] sm:$0x1]  ;;  %230 = vst.msk [vmem:[%s648_s17 + $0x39] sm:$0x1] %vm178_vm0, %v226_v54 }
  0x4e   : > { %238 = vst.msk [vmem:[%s648_s17 + $0x38] sm:$0x1] %vm178_vm0, %v234_v55  ;;  %246 = vst.msk [vmem:[%s648_s17 + $0x37] sm:$0x1] %vm178_vm0, %v242_v56  ;;  %v250_v57 = vld [vmem:[%s638_s15 + $0x39] sm:$0x1] }
  0x4f   : > { %v258_v58 = vld [vmem:[%s638_s15 + $0x3a] sm:$0x1]  ;;  %v266_v59 = vld [vmem:[%s638_s15 + $0x3b] sm:$0x1]  ;;  %254 = vst.msk [vmem:[%s648_s17 + $0x36] sm:$0x1] %vm178_vm0, %v250_v57 }
  0x50   : > { %262 = vst.msk [vmem:[%s648_s17 + $0x35] sm:$0x1] %vm178_vm0, %v258_v58  ;;  %270 = vst.msk [vmem:[%s648_s17 + $0x34] sm:$0x1] %vm178_vm0, %v266_v59  ;;  %v274_v60 = vld [vmem:[%s638_s15 + $0x3c] sm:$0x1] }
  0x51   : > { %v282_v61 = vld [vmem:[%s638_s15 + $0x3d] sm:$0x1]  ;;  %v290_v62 = vld [vmem:[%s638_s15 + $0x3e] sm:$0x1]  ;;  %278 = vst.msk [vmem:[%s648_s17 + $0x33] sm:$0x1] %vm178_vm0, %v274_v60 }
  0x52   : > { %286 = vst.msk [vmem:[%s648_s17 + $0x32] sm:$0x1] %vm178_vm0, %v282_v61  ;;  %294 = vst.msk [vmem:[%s648_s17 + $0x31] sm:$0x1] %vm178_vm0, %v290_v62  ;;  %v298_v63 = vld [vmem:[%s638_s15 + $0x3f] sm:$0x1] }
  0x53   : > { %302 = vst.msk [vmem:[%s648_s17 + $0x30] sm:$0x1] %vm178_vm0, %v298_v63 }
  0x54 PF: > { %s14_s11 = sadd.s32 1, %s554_s11   ;;  %s865_s6 = smov %s538_s7 }
  0x55   : > { %p11_p7 = scmp.ge.s32.totalorder %s14_s11, 4   ;;  %s866_s7 = smov %s542_s8 }
  0x56   : > { %s867_s8 = smov %s618_s18  ;;  %s868_s9 = smov %s550_s10 }
  0x57   : > { %s869_s10 = smov %s871_s13  ;;  %13 = sbr.rel (!%p11_p7) target bundleno = 4 (0x4), region = 64 }
  0x5c   :  { %336 = vsyncpa [#allocation3], 1 }
  0x5d   :  { %338 = vsyncpa [#allocation3 + $0x1], 1 }

</bundles_post_ra>
